<compile_context>
chip_gen: v5e
topology: v5e:2x2
jax: 0.10.0
libtpu: 0.0.40
codegen_flags: <defaults>
</compile_context>

<pallas_src>
import functools

import jax
import jax.numpy as jnp
from jax.experimental import pallas as pl
from jax.experimental.pallas import tpu as pltpu

SMOOTH = 1.0   # BinaryDiceLoss smooth
P_POW = 2      # BinaryDiceLoss p (denominator power, hard-wired as squaring)
LANE = 128     # TPU lane width


def _dice_kernel(p_ref, t_ref, num_ref, den_ref, *,
                 s1, ts1, tiles_per_chunk, needs_row_mask):
    """One (spatial-chunk, sample, spatial-tile) grid step.

    p_ref, t_ref    : (C, ts1, 128) VMEM blocks (logits / target), native dtype.
    num_ref/den_ref : (C, 128) f32 output blocks, resident across the spatial
                      grid axis -> used directly as accumulators.
    """
    par = pl.program_id(0)
    s = pl.program_id(2)

    # Cast after the load so bf16/int inputs travel over HBM at native width.
    x = p_ref[...].astype(jnp.float32)      # (C, ts1, 128)
    t = t_ref[...].astype(jnp.float32)      # (C, ts1, 128)

    if needs_row_mask:
        # Only compiled when the last global spatial tile is partial: rows
        # >= s1 of that block are undefined (stale VMEM).  Zero BOTH inputs
        # there BEFORE exp so no NaN/Inf can leak in.  Zero logits => softmax
        # is exactly 1/C on masked rows; that deterministic den pollution is
        # subtracted in closed form in the wrapper, so `sm` needs no mask.
        base = (par * tiles_per_chunk + s) * ts1
        row = jax.lax.broadcasted_iota(jnp.int32, (ts1, LANE), 0)
        valid = (base + row) < s1                     # (ts1, 128)
        x = jnp.where(valid[None], x, 0.0)
        t = jnp.where(valid[None], t, 0.0)

    # Channel softmax: elementwise max/sum across the C planes (VPU); one EUP
    # approx reciprocal + one Newton step (f32-accurate) per spatial position.
    m = jnp.max(x, axis=0, keepdims=True)             # (1, ts1, 128)
    e = jnp.exp(x - m)                                 # (C, ts1, 128)
    d = jnp.sum(e, axis=0, keepdims=True)              # (1, ts1, 128)
    r = pl.reciprocal(d, approx=True)
    inv = r * (2.0 - d * r)                            # Newton refinement
    sm = e * inv                                       # (C, ts1, 128)

    # Per-class partial reductions over the sublane (spatial-chunk) axis.
    num_part = jnp.sum(sm * t, axis=1)                 # (C, 128)
    den_part = jnp.sum(sm * sm + t * t, axis=1)        # (C, 128)  (p = 2)

    @pl.when(s == 0)
    def _():
        num_ref[...] = jnp.zeros_like(num_ref)
        den_ref[...] = jnp.zeros_like(den_ref)

    num_ref[...] += num_part
    den_ref[...] += den_part


def _pick_ts1(s1, c, itemsize, target_block_bytes=1 << 20):
    """Spatial tile rows (multiple of 8) from a ~1 MiB-per-input-block budget."""
    target = max(8, (target_block_bytes // (c * LANE * itemsize)) // 8 * 8)
    if s1 <= target:
        return s1                    # single tile; full-dim block is legal
    # Prefer a multiple-of-8 divisor of s1 near the target: no tail masking.
    d = target
    while d >= max(8, target // 4):
        if s1 % d == 0:
            return d
        d -= 8
    return target                    # tail tile gets the in-kernel row mask


def dice_loss(predict, target, *, weight=None, ignore_index=None):
    """predict, target: (N, C, *spatial) with matching shapes.  Scalar loss."""
    assert predict.shape == target.shape, "predict & target shape do not match"
    N, C = predict.shape[0], predict.shape[1]
    S = 1
    for d in predict.shape[2:]:
        S *= d

    # No wrapper dtype cast: pass native dtype, cast in-kernel after the load.
    p = predict.reshape(N, C, S)
    t = target.reshape(N, C, S)

    s1 = pl.cdiv(S, LANE)
    # Lane-tail padding only when S % 128 != 0 (zeros; corrected at finalize).
    if s1 * LANE != S:
        pad = s1 * LANE - S
        p = jnp.pad(p, ((0, 0), (0, 0), (0, pad)))
        t = jnp.pad(t, ((0, 0), (0, 0), (0, pad)))
    p4 = p.reshape(N, C, s1, LANE)
    t4 = t.reshape(N, C, s1, LANE)

    itemsize = max(predict.dtype.itemsize, target.dtype.itemsize)
    ts1 = _pick_ts1(s1, C, itemsize)
    n_s = pl.cdiv(s1, ts1)
    needs_row_mask = (s1 % ts1) != 0

    # v7x has 2 TensorCores; if the batch axis can't feed both, split the
    # spatial axis into 2 parallel super-chunks (harmless on v5e/v6e).
    n_par = 2 if (N == 1 and n_s % 2 == 0 and n_s >= 2) else 1
    tiles_per_chunk = n_s // n_par

    kernel = functools.partial(
        _dice_kernel, s1=s1, ts1=ts1, tiles_per_chunk=tiles_per_chunk,
        needs_row_mask=needs_row_mask)

    # Explicit VMEM budget: >= 2x the double-buffered pipeline footprint,
    # >= 32 MiB (raises v5e's 16 MiB scoped default), <= 48 MiB (v7x headroom).
    pipe_bytes = (2 * C * ts1 * LANE
                  * (predict.dtype.itemsize + target.dtype.itemsize)
                  + 4 * C * LANE * 4)
    vmem_limit = int(min(48 << 20, max(32 << 20, 2 * pipe_bytes)))

    num_p, den_p = pl.pallas_call(
        kernel,
        out_shape=(
            jax.ShapeDtypeStruct((n_par, N, C, LANE), jnp.float32),
            jax.ShapeDtypeStruct((n_par, N, C, LANE), jnp.float32),
        ),
        grid_spec=pltpu.PrefetchScalarGridSpec(
            num_scalar_prefetch=0,
            grid=(n_par, N, tiles_per_chunk),
            in_specs=[
                pl.BlockSpec((None, C, ts1, LANE),
                             lambda par, n, s: (n, 0, par * tiles_per_chunk + s, 0)),
                pl.BlockSpec((None, C, ts1, LANE),
                             lambda par, n, s: (n, 0, par * tiles_per_chunk + s, 0)),
            ],
            out_specs=[
                pl.BlockSpec((None, None, C, LANE),
                             lambda par, n, s: (par, n, 0, 0)),
                pl.BlockSpec((None, None, C, LANE),
                             lambda par, n, s: (par, n, 0, 0)),
            ],
        ),
        compiler_params=pltpu.CompilerParams(
            dimension_semantics=("parallel", "parallel", "arbitrary"),
            vmem_limit_bytes=vmem_limit,
        ),
    )(p4, t4)

    # Tiny wrapper finalize: lane/chunk sums, padding correction, smooth,
    # per-class dice, batch mean, /C.
    num = num_p.sum(axis=(0, 3))                     # (N, C)
    den = den_p.sum(axis=(0, 3))                     # (N, C)
    pad_count = n_s * ts1 * LANE - S                 # zero-padded + masked rows
    if pad_count:
        # Every padded/masked position has softmax exactly 1/C and target 0,
        # so it added exactly (1/C)^2 to each class's denominator.
        den = den - pad_count / (C * C)
    num = num + SMOOTH
    den = den + SMOOTH
    per_class = jnp.mean(1.0 - num / den, axis=0)    # (C,) mean over batch
    if weight is not None:
        per_class = per_class * jnp.asarray(weight, per_class.dtype)
    if ignore_index is not None:
        per_class = per_class.at[ignore_index].set(0.0)
    return jnp.sum(per_class) / C


def _reference(predict, target):
    """Pure-JAX reference replicating the PyTorch forward exactly."""
    N, C = predict.shape[0], predict.shape[1]
    sm = jax.nn.softmax(predict, axis=1)
    total = 0.0
    for i in range(C):
        p = sm[:, i].reshape(N, -1)
        t = target[:, i].reshape(N, -1)
        num = jnp.sum(p * t, axis=1) + SMOOTH
        den = jnp.sum(p ** P_POW + t ** P_POW, axis=1) + SMOOTH
        total = total + jnp.mean(1.0 - num / den)
    return total / C


if __name__ == "__main__":
    key = jax.random.PRNGKey(0)
    k1, k2 = jax.random.split(key)

    N, C, H, W = 2, 4, 16, 16
    predict = jax.random.normal(k1, (N, C, H, W), dtype=jnp.float32)
    # one-hot target over the class axis (typical dice-loss input)
    cls = jax.random.randint(k2, (N, H, W), 0, C)
    target = jax.nn.one_hot(cls, C, dtype=jnp.float32).transpose(0, 3, 1, 2)

    out = dice_loss(predict, target)
    out = jax.block_until_ready(out)

    ref = _reference(predict, target)
    assert jnp.allclose(out, ref, atol=1e-5, rtol=1e-5), (out, ref)

    print("KERNEL_OK")
</pallas_src>

<mosaic_0001>
module attributes {stable_mosaic.version = 11 : i64} {
  func.func @_dice_kernel(%arg0: i32, %arg1: i32, %arg2: i32, %arg3: memref<1x4x2x128xf32, #tpu.memory_space<vmem>>, %arg4: memref<1x4x2x128xf32, #tpu.memory_space<vmem>>, %arg5: memref<1x1x4x128xf32, #tpu.memory_space<vmem>>, %arg6: memref<1x1x4x128xf32, #tpu.memory_space<vmem>>) attributes {dimension_semantics = [#tpu.dimension_semantics<parallel>, #tpu.dimension_semantics<parallel>, #tpu.dimension_semantics<arbitrary>], iteration_bounds = array<i64: 1, 2, 1>, scalar_prefetch = 0 : i64, scratch_operands = 0 : i64, tpu.core_type = #tpu.core_type<tc>, window_params = [{transform_indices = @transform_0, window_bounds = array<i64: 1, 4, 2, 128>}, {transform_indices = @transform_1, window_bounds = array<i64: 1, 4, 2, 128>}, {transform_indices = @transform_2, window_bounds = array<i64: 1, 1, 4, 128>}, {transform_indices = @transform_3, window_bounds = array<i64: 1, 1, 4, 128>}]} {
    %c0 = arith.constant 0 : index
    %c0_0 = arith.constant 0 : index
    %c0_1 = arith.constant 0 : index
    %c0_2 = arith.constant 0 : index
    %0 = vector.load %arg3[%c0, %c0_0, %c0_1, %c0_2] : memref<1x4x2x128xf32, #tpu.memory_space<vmem>>, vector<1x4x2x128xf32>
    %1 = vector.shape_cast %0 : vector<1x4x2x128xf32> to vector<4x2x128xf32>
    %c0_3 = arith.constant 0 : index
    %c0_4 = arith.constant 0 : index
    %c0_5 = arith.constant 0 : index
    %c0_6 = arith.constant 0 : index
    %2 = vector.load %arg4[%c0_3, %c0_4, %c0_5, %c0_6] : memref<1x4x2x128xf32, #tpu.memory_space<vmem>>, vector<1x4x2x128xf32>
    %3 = vector.shape_cast %2 : vector<1x4x2x128xf32> to vector<4x2x128xf32>
    %cst = arith.constant dense<0xFF800000> : vector<2x128xf32>
    %4 = vector.multi_reduction <maximumf>, %1, %cst [0] : vector<4x2x128xf32> to vector<2x128xf32>
    %5 = vector.shape_cast %4 : vector<2x128xf32> to vector<1x2x128xf32>
    %6 = vector.broadcast %5 : vector<1x2x128xf32> to vector<4x2x128xf32>
    %7 = arith.subf %1, %6 : vector<4x2x128xf32>
    %8 = math.exp %7 : vector<4x2x128xf32>
    %cst_7 = arith.constant dense<0.000000e+00> : vector<2x128xf32>
    %9 = vector.multi_reduction <add>, %8, %cst_7 [0] : vector<4x2x128xf32> to vector<2x128xf32>
    %10 = vector.shape_cast %9 : vector<2x128xf32> to vector<1x2x128xf32>
    %11 = tpu.reciprocal %10 {approx = true} : vector<1x2x128xf32> -> vector<1x2x128xf32>
    %12 = arith.mulf %10, %11 : vector<1x2x128xf32>
    %cst_8 = arith.constant 2.000000e+00 : f32
    %13 = vector.broadcast %cst_8 : f32 to vector<1x2x128xf32>
    %14 = arith.subf %13, %12 : vector<1x2x128xf32>
    %15 = arith.mulf %11, %14 : vector<1x2x128xf32>
    %16 = vector.broadcast %15 : vector<1x2x128xf32> to vector<4x2x128xf32>
    %17 = arith.mulf %8, %16 : vector<4x2x128xf32>
    %18 = arith.mulf %17, %3 : vector<4x2x128xf32>
    %cst_9 = arith.constant dense<0.000000e+00> : vector<4x128xf32>
    %19 = vector.multi_reduction <add>, %18, %cst_9 [1] : vector<4x2x128xf32> to vector<4x128xf32>
    %20 = arith.mulf %17, %17 : vector<4x2x128xf32>
    %21 = arith.mulf %3, %3 : vector<4x2x128xf32>
    %22 = arith.addf %20, %21 : vector<4x2x128xf32>
    %cst_10 = arith.constant dense<0.000000e+00> : vector<4x128xf32>
    %23 = vector.multi_reduction <add>, %22, %cst_10 [1] : vector<4x2x128xf32> to vector<4x128xf32>
    %c0_i32 = arith.constant 0 : i32
    %24 = arith.cmpi eq, %arg2, %c0_i32 : i32
    %25 = arith.extui %24 : i1 to i32
    %c0_i32_11 = arith.constant 0 : i32
    %26 = arith.cmpi ne, %25, %c0_i32_11 : i32
    scf.if %26 {
      %cst_28 = arith.constant 0.000000e+00 : f32
      %39 = vector.broadcast %cst_28 : f32 to vector<4x128xf32>
      %c0_29 = arith.constant 0 : index
      %c0_30 = arith.constant 0 : index
      %c0_31 = arith.constant 0 : index
      %c0_32 = arith.constant 0 : index
      %40 = vector.load %arg5[%c0_29, %c0_30, %c0_31, %c0_32] : memref<1x1x4x128xf32, #tpu.memory_space<vmem>>, vector<1x1x4x128xf32>
      %41 = vector.shape_cast %40 : vector<1x1x4x128xf32> to vector<4x128xf32>
      %42 = vector.shape_cast %39 : vector<4x128xf32> to vector<1x1x4x128xf32>
      tpu.vector_store %arg5[%c0_29, %c0_30, %c0_31, %c0_32], %42 {strides = array<i32>} : memref<1x1x4x128xf32, #tpu.memory_space<vmem>>, vector<1x1x4x128xf32>,
      %cst_33 = arith.constant 0.000000e+00 : f32
      %43 = vector.broadcast %cst_33 : f32 to vector<4x128xf32>
      %c0_34 = arith.constant 0 : index
      %c0_35 = arith.constant 0 : index
      %c0_36 = arith.constant 0 : index
      %c0_37 = arith.constant 0 : index
      %44 = vector.load %arg6[%c0_34, %c0_35, %c0_36, %c0_37] : memref<1x1x4x128xf32, #tpu.memory_space<vmem>>, vector<1x1x4x128xf32>
      %45 = vector.shape_cast %44 : vector<1x1x4x128xf32> to vector<4x128xf32>
      %46 = vector.shape_cast %43 : vector<4x128xf32> to vector<1x1x4x128xf32>
      tpu.vector_store %arg6[%c0_34, %c0_35, %c0_36, %c0_37], %46 {strides = array<i32>} : memref<1x1x4x128xf32, #tpu.memory_space<vmem>>, vector<1x1x4x128xf32>,
    } else {
    }
    %c0_12 = arith.constant 0 : index
    %c0_13 = arith.constant 0 : index
    %c0_14 = arith.constant 0 : index
    %c0_15 = arith.constant 0 : index
    %27 = vector.load %arg5[%c0_12, %c0_13, %c0_14, %c0_15] : memref<1x1x4x128xf32, #tpu.memory_space<vmem>>, vector<1x1x4x128xf32>
    %28 = vector.shape_cast %27 : vector<1x1x4x128xf32> to vector<4x128xf32>
    %29 = arith.addf %28, %19 : vector<4x128xf32>
    %c0_16 = arith.constant 0 : index
    %c0_17 = arith.constant 0 : index
    %c0_18 = arith.constant 0 : index
    %c0_19 = arith.constant 0 : index
    %30 = vector.load %arg5[%c0_16, %c0_17, %c0_18, %c0_19] : memref<1x1x4x128xf32, #tpu.memory_space<vmem>>, vector<1x1x4x128xf32>
    %31 = vector.shape_cast %30 : vector<1x1x4x128xf32> to vector<4x128xf32>
    %32 = vector.shape_cast %29 : vector<4x128xf32> to vector<1x1x4x128xf32>
    tpu.vector_store %arg5[%c0_16, %c0_17, %c0_18, %c0_19], %32 {strides = array<i32>} : memref<1x1x4x128xf32, #tpu.memory_space<vmem>>, vector<1x1x4x128xf32>,
    %c0_20 = arith.constant 0 : index
    %c0_21 = arith.constant 0 : index
    %c0_22 = arith.constant 0 : index
    %c0_23 = arith.constant 0 : index
    %33 = vector.load %arg6[%c0_20, %c0_21, %c0_22, %c0_23] : memref<1x1x4x128xf32, #tpu.memory_space<vmem>>, vector<1x1x4x128xf32>
    %34 = vector.shape_cast %33 : vector<1x1x4x128xf32> to vector<4x128xf32>
    %35 = arith.addf %34, %23 : vector<4x128xf32>
    %c0_24 = arith.constant 0 : index
    %c0_25 = arith.constant 0 : index
    %c0_26 = arith.constant 0 : index
    %c0_27 = arith.constant 0 : index
    %36 = vector.load %arg6[%c0_24, %c0_25, %c0_26, %c0_27] : memref<1x1x4x128xf32, #tpu.memory_space<vmem>>, vector<1x1x4x128xf32>
    %37 = vector.shape_cast %36 : vector<1x1x4x128xf32> to vector<4x128xf32>
    %38 = vector.shape_cast %35 : vector<4x128xf32> to vector<1x1x4x128xf32>
    tpu.vector_store %arg6[%c0_24, %c0_25, %c0_26, %c0_27], %38 {strides = array<i32>} : memref<1x1x4x128xf32, #tpu.memory_space<vmem>>, vector<1x1x4x128xf32>,
    return
  }
  func.func @transform_0(%arg0: i32, %arg1: i32, %arg2: i32) -> (i32, i32, i32, i32) {
    %c1_i32 = arith.constant 1 : i32
    %0 = arith.muli %arg0, %c1_i32 : i32
    %1 = arith.addi %0, %arg2 : i32
    %c0_i32 = arith.constant 0 : i32
    %c0_i32_0 = arith.constant 0 : i32
    %c0_i32_1 = arith.constant 0 : i32
    return %arg1, %c0_i32, %1, %c0_i32_0 : i32, i32, i32, i32
  }
  func.func @transform_1(%arg0: i32, %arg1: i32, %arg2: i32) -> (i32, i32, i32, i32) {
    %c1_i32 = arith.constant 1 : i32
    %0 = arith.muli %arg0, %c1_i32 : i32
    %1 = arith.addi %0, %arg2 : i32
    %c0_i32 = arith.constant 0 : i32
    %c0_i32_0 = arith.constant 0 : i32
    %c0_i32_1 = arith.constant 0 : i32
    return %arg1, %c0_i32, %1, %c0_i32_0 : i32, i32, i32, i32
  }
  func.func @transform_2(%arg0: i32, %arg1: i32, %arg2: i32) -> (i32, i32, i32, i32) {
    %c0_i32 = arith.constant 0 : i32
    %c0_i32_0 = arith.constant 0 : i32
    %c0_i32_1 = arith.constant 0 : i32
    return %arg0, %arg1, %c0_i32, %c0_i32_0 : i32, i32, i32, i32
  }
  func.func @transform_3(%arg0: i32, %arg1: i32, %arg2: i32) -> (i32, i32, i32, i32) {
    %c0_i32 = arith.constant 0 : i32
    %c0_i32_0 = arith.constant 0 : i32
    %c0_i32_1 = arith.constant 0 : i32
    return %arg0, %arg1, %c0_i32, %c0_i32_0 : i32, i32, i32, i32
  }
}

</mosaic_0001>

<bundles_post_ra>
// kernel: tpu_custom_call.1
= control target key start
LH: loop header
LB: loop body
LE: loop exit
PB: predicated region body
PF: predicated region fallthrough
CT: control target
= control target key end

     0   :  { %s1127_s0 = inlined_call_operand.hbm [shape: f32[2,4,2,128], index: 0, kind: input, shape index: {}]   ;;  %s1128_s1 = inlined_call_operand.hbm [shape: f32[2,4,2,128], index: 1, kind: input, shape index: {}]   ;;  %s1129_s2 = inlined_call_operand.hbm [shape: f32[1,2,4,128], index: 2, kind: output, shape index: {0}]   ;;  %s1130_s3 = inlined_call_operand.hbm [shape: f32[1,2,4,128], index: 3, kind: output, shape index: {1}]  }
   0x1   :  { %1131 = sst [smem:[#allocation14_spill]] %s1127_s0 }
   0x2   :  { %9 = vsyncpa [#allocation3], 0 }
   0x3   :  { %11 = vsyncpa [#allocation3 + $0x1], 0 }
   0x4   :  { %12 = vsyncpa [#allocation6], 0 }
   0x5   :  { %14 = vsyncpa [#allocation6 + $0x1], 0 }
   0x6   :  { %15 = vsyncpa [#allocation4], 0 }
   0x7   :  { %17 = vsyncpa [#allocation4 + $0x1], 0 }
   0x8   :  { %18 = vsyncpa [#allocation9], 0 }
   0x9   :  { %20 = vsyncpa [#allocation9 + $0x1], 0  ;;  %s924_s12 = smov 0   ;;  %s926_s13 = smov 0  }
   0xa   :  { %s928_s14 = smov 0   ;;  %s930_s15 = smov 0  }
   0xb   :  { %s932_s16 = smov 0   ;;  %s934_s17 = smov 0  }
   0xc LB: > { %s613_s18 = sadd.s32 4294967295, %s899_s17   ;;  %s614_s19 = sadd.s32 4294967294, %s899_s17   ;;  %s899_s17 = sphi %s934_s17, %s26_s17   ;;  %s895_s16 = sphi %s932_s16, %s1142_s16   ;;  %s891_s15 = sphi %s930_s15, %s1141_s15   ;;  %s887_s14 = sphi %s928_s14, %s1140_s14   ;;  %s883_s13 = sphi %s926_s13, %s1139_s13   ;;  %s879_s12 = sphi %s924_s12, %s1138_s12  }
   0xd   : > { %s41_s20 = sadd.s32 1, %s895_s16  ;;  %s56_s21 = sadd.s32 1, %s887_s14 }
   0xe   : > { %p43_p0 = scmp.ge.s32.totalorder %s41_s20, 2  ;;  %p63_p1 = scmp.ne.s32.totalorder %s887_s14, %s883_s13 }
   0xf   : > { %p64_p2 = scmp.eq.s32.totalorder %s899_s17, 0  ;;  %p69_p3 = scmp.ne.s32.totalorder %s883_s13, %s879_s12 }
  0x10   : > { %s1144_s20 = smov (%p43_p0, %s41_s20), 0  ;;  %p70_p5 = scmp.eq.s32.totalorder %s613_s18, 0 }
  0x11   : > { %p965_p4 = por %p64_p2, %p63_p1  ;;  %s51_s23 = ssub.s32 %s895_s16, %s1144_s20 }
  0x12   : > { %p125_p6 = scmp.eq.s32.totalorder %s613_s18, 1  ;;  %p54_p7 = scmp.eq.s32.totalorder %s51_s23, 0 }
  0x13   : > { %p971_p8 = por %p70_p5, %p69_p3  ;;  %p131_p10 = scmp.eq.s32.totalorder %s614_s19, 1 }
  0x14   : > { %p975_p9 = por %p125_p6, %p63_p1  ;;  %p616_p12 = scmp.ge.s32.totalorder %s899_s17, 2 }
  0x15   : > { %s980_s26 = scalar_select %p54_p7, %s887_s14, %s56_s21  }
  0x16   : > { %p982_p11 = por %p131_p10, %p69_p3  ;;  %p658_p13 = scmp.lt.s32.totalorder %s899_s17, 2 }
  0x17   : > { %s989_s28 = sand.u32 1, %s887_s14   ;;  %s634_s30 = sshll.u32 %s895_s16, 3 }
  0x18   : > { %s617_s29 = sshll.u32 %s989_s28, 3  ;;  %s1136_s0 = sld [smem:[#allocation14_spill]] }
  0x19   : > { %s183_s7 = scalar_lea.vmem [#allocation2], %s617_s29  ;;  %p998_p0 = pnand %p658_p13, %p965_p4 }
  0x1a   : > { %s193_s8 = sshll.u32 %s183_s7, 4  ;;  %p623_p1 = scmp.ge.s32.totalorder %s899_s17, 1  ;;  %s194_s8 = int_to_ptr.vmem [resolvable:$true] %s193_s8 }
  0x1b   : > { %s180_s11 = scalar_lea.sflag [#allocation3], %s989_s28  ;;  %s901_s18 = smov 32  }
  0x1c   : > { %s902_s19 = smov 2   ;;  %p225_p2 = scmp.lt.s32.totalorder %s899_s17, 3 }
  0x1d   : > { %s214_s4 = scalar_lea.hbm %s1128_s1, %s634_s30  ;;  %s207_s22 = scalar_lea.vmem [#allocation5], %s617_s29 }
  0x1e   : > { %s190_s6 = scalar_lea.hbm %s1136_s0, %s634_s30  ;;  %p226_p3 = pnand %p623_p1, %p225_p2 }
  0x1f   : > { %s191_s9 = sshll.u32 %s190_s6, 4  ;;  %s215_s5 = sshll.u32 %s214_s4, 4  ;;  %s192_s9 = int_to_ptr.hbm [resolvable:$true] %s191_s9  ;;  %s216_s5 = int_to_ptr.hbm [resolvable:$true] %s215_s5 }
  0x20   : > { %647 = dma.hbm_to_vmem [thread:$0]  (!%p998_p0), %s192_s9, 128, %s194_s8, %s180_s11, %s901_s18, %s901_s18, %s902_s19  }
  0x21   : > { %s217_s6 = sshll.u32 %s207_s22, 4  ;;  %s204_s7 = scalar_lea.sflag [#allocation6], %s989_s28  ;;  %s218_s6 = int_to_ptr.vmem [resolvable:$true] %s217_s6 }
  0x22   : > { %650 = dma.hbm_to_vmem [thread:$0]  (!%p998_p0), %s216_s5, 128, %s218_s6, %s204_s7, %s901_s18, %s901_s18, %s902_s19  }
  0x23   : > { %229 = sbr.rel (%p226_p3) target bundleno = 121 (0x79), region = 28  ;;  %s1014_s0 = sand.u32 (!%p226_p3), 1, %s883_s13  }
  0x24   : > { %s624_s8 = sshll.u32 (!%p226_p3), %s1014_s0, 3  ;;  %s232_s9 = scalar_lea.sflag (!%p226_p3), [#allocation3], %s1014_s0 }
  0x25   : > { %s235_s11 = scalar_lea.vmem (!%p226_p3), [#allocation2], %s624_s8 }
  0x28   : > { %862 = dma.done.wait (%p971_p8), %s232_s9, 128  }
  0x29   : > { %864 = vsyncadd (%p971_p8), %s232_s9, 4294967168  ;;  %s242_s28 = scalar_lea.sflag [#allocation6], %s1014_s0  ;;  %s1023_s29 = scalar_lea.vmem [#allocation5], %s624_s8 }
  0x2a   : > { %866 = dma.done.wait (%p971_p8), %s242_s28, 128  }
  0x2b   : > { %868 = vsyncadd (%p971_p8), %s242_s28, 4294967168  ;;  %s626_s30 = sshll.u32 %s1014_s0, 2  ;;  %v903_v0 = vmov 0.0   ;;  %vm289_vm0 = vcmask 1041408   ;;  %v281_v1 = vld [vmem:[%s235_s11] sm:$0x3] }
  0x2c   : > { %s1030_s10 = scalar_lea.vmem [#allocation7], %s626_s30  ;;  %s1033_s18 = scalar_lea.vmem [#allocation8], %s626_s30  ;;  %v282_v2 = vld [vmem:[%s235_s11 + $0x2] sm:$0x3]  ;;  %v283_v3 = vld [vmem:[%s235_s11 + $0x4] sm:$0x3] }
  0x2d   : > { %400 = vst [vmem:[%s1030_s10] sm:$0xf] %v903_v0  ;;  %v284_v4 = vld [vmem:[%s235_s11 + $0x6] sm:$0x3]  ;;  %v290_v5 = vsel %vm289_vm0, %v281_v1, -inf  ;;  %v291_v6 = vsel %vm289_vm0, %v282_v2, -inf  ;;  %v292_v7 = vsel %vm289_vm0, %v283_v3, -inf }
  0x2e   : > { %401 = vst [vmem:[%s1033_s18] sm:$0xf] %v903_v0  ;;  %v293_v8 = vsel %vm289_vm0, %v284_v4, -inf  ;;  %v294_v9 = vmax.f32 %v290_v5, %v291_v6  ;;  %v285_v34 = vld [vmem:[%s1023_s29] sm:$0x3]  ;;  %v286_v35 = vld [vmem:[%s1023_s29 + $0x2] sm:$0x3] }
  0x2f   : > { %v295_v10 = vmax.f32 %v292_v7, %v293_v8  ;;  %v287_v36 = vld [vmem:[%s1023_s29 + $0x4] sm:$0x3]  ;;  %v288_v37 = vld [vmem:[%s1023_s29 + $0x6] sm:$0x3]  ;;  %v360_v43 = vmul.f32 %v285_v34, %v285_v34  ;;  %v361_v44 = vmul.f32 %v286_v35, %v286_v35  ;;  %vm407_vm1 = vcmask 1041409   ;;  %s630_s24 = sshll.u32 %s891_s15, 2 }
  0x30   : > { %v362_v45 = vmul.f32 %v287_v36, %v287_v36  ;;  %v363_v46 = vmul.f32 %v288_v37, %v288_v37  ;;  %vm409_vm2 = vcmask 1042434   ;;  %vm411_vm3 = vcmask 1043459   ;;  %s445_s23 = scalar_lea.hbm %s1129_s2, %s630_s24  ;;  %s447_s4 = sshll.u32 %s1030_s10, 4  ;;  %s448_s4 = int_to_ptr.vmem [resolvable:$true] %s447_s4 }
  0x31   : > { %v296_v11 = vmax.f32 %v294_v9, %v295_v10  ;;  %s449_s5 = sshll.u32 %s445_s23, 4  ;;  %s1072_s7 = scalar_lea.hbm %s1130_s3, %s630_s24  ;;  %s450_s5 = int_to_ptr.hbm [resolvable:$true] %s449_s5 }
  0x32   : > { %s463_s8 = sshll.u32 %s1033_s18, 4  ;;  %s465_s15 = sshll.u32 %s1072_s7, 4  ;;  %s464_s8 = int_to_ptr.vmem [resolvable:$true] %s463_s8  ;;  %s466_s15 = int_to_ptr.hbm [resolvable:$true] %s465_s15 }
  0x33   : > { %v297_v12 = vsub.f32 %v281_v1, %v296_v11  ;;  %v298_v13 = vsub.f32 %v282_v2, %v296_v11  ;;  %v299_v14 = vsub.f32 %v283_v3, %v296_v11  ;;  %v300_v15 = vsub.f32 %v284_v4, %v296_v11  ;;  %s428_s9 = scalar_lea.sflag [#allocation4], %s1014_s0  ;;  %s795_s11 = sshra.s32 %s450_s5, 4  ;;  %s796_s11 = int_to_ptr.hbm [resolvable:$true] %s795_s11 }
  0x34   : > { %s797_s28 = scalar_lea.hbm %s796_s11, 4  ;;  %s801_s24 = scalar_lea.hbm %s1129_s2, 8 }
  0x35   : > { %v301_v16 = vmul.f32 1.442695, %v297_v12  ;;  %v303_v17 = vmul.f32 1.442695, %v298_v13  ;;  %v305_v18 = vmul.f32 1.442695, %v299_v14  ;;  %p798_p4 = scmp.ne.s32.totalorder %s796_s11, %s797_s28  ;;  %p802_p7 = scmp.lt.s32.totalorder %s796_s11, %s1129_s2 }
  0x36   : > { %v307_v19 = vmul.f32 1.442695, %v300_v15  ;;  %p803_p8 = scmp.lt.s32.totalorder %s801_s24, %s797_s28 }
  0x37   : > { %711 = vpow2.f32 %v301_v16  ;;  %p799_p5 = pnand %p798_p4, %p975_p9 }
  0x38   : > { %713 = vpow2.f32 %v303_v17  ;;  %p804_p10 = por %p803_p8, %p802_p7 }
  0x39   : > { %715 = vpow2.f32 %v305_v18  ;;  %p800_p6 = pneg %p799_p5 }
  0x3a   : > { %717 = vpow2.f32 %v307_v19 }
  0x3b   : > { %p805_p13 = pnand %p804_p10, %p800_p6 }
  0x3d   : > { %v712_v20 = vpop.eup %711 }
  0x3e   : > { %v714_v21 = vpop.eup %713  ;;  %v309_v22 = vsel %vm289_vm0, %v712_v20, 0.0 }
  0x3f   : > { %v716_v23 = vpop.eup %715  ;;  %v310_v24 = vsel %vm289_vm0, %v714_v21, 0.0 }
  0x40   : > { %v718_v25 = vpop.eup %717  ;;  %v311_v26 = vadd.f32 %v310_v24, %v309_v22  ;;  %v312_v27 = vsel %vm289_vm0, %v716_v23, 0.0 }
  0x41   : > { %v314_v28 = vsel %vm289_vm0, %v718_v25, 0.0 }
  0x42   : > { %v313_v29 = vadd.f32 %v312_v27, %v311_v26 }
  0x44   : > { %v315_v30 = vadd.f32 %v314_v28, %v313_v29 }
  0x46   : > { %719 = vrcp.f32 %v315_v30 }
  0x4c   : > { %v720_v31 = vpop.eup %719 }
  0x4d   : > { %v317_v32 = vmul.f32 %v720_v31, %v315_v30 }
  0x4f   : > { %v318_v33 = vsub.f32 2.0, %v317_v32 }
  0x51   : > { %v319_v38 = vmul.f32 %v720_v31, %v318_v33 }
  0x53   : > { %v320_v39 = vmul.f32 %v712_v20, %v319_v38  ;;  %v321_v40 = vmul.f32 %v714_v21, %v319_v38  ;;  %v322_v41 = vmul.f32 %v716_v23, %v319_v38  ;;  %v323_v42 = vmul.f32 %v718_v25, %v319_v38 }
  0x55   : > { %v324_v47 = vmul.f32 %v320_v39, %v285_v34  ;;  %v325_v48 = vmul.f32 %v321_v40, %v286_v35  ;;  %v326_v49 = vmul.f32 %v322_v41, %v287_v36  ;;  %v327_v50 = vmul.f32 %v323_v42, %v288_v37 }
  0x56   : > { %v356_v51 = vmul.f32 %v320_v39, %v320_v39  ;;  %v357_v52 = vmul.f32 %v321_v40, %v321_v40  ;;  %v358_v53 = vmul.f32 %v322_v41, %v322_v41  ;;  %v359_v54 = vmul.f32 %v323_v42, %v323_v42 }
  0x57   : > { %v328_v55 = vsel %vm289_vm0, %v324_v47, 0.0  ;;  %v335_v56 = vsel %vm289_vm0, %v325_v48, 0.0  ;;  %v342_v57 = vsel %vm289_vm0, %v326_v49, 0.0  ;;  %v349_v58 = vsel %vm289_vm0, %v327_v50, 0.0 }
  0x58   : > { %v329_v59 = vrot.slane %v328_v55, 4  ;;  %v336_v60 = vrot.slane %v335_v56, 4  ;;  %v343_v61 = vrot.slane %v342_v57, 4  ;;  %v350_v62 = vrot.slane %v349_v58, 4 }
  0x59   : > { %v364_v63 = vadd.f32 %v360_v43, %v356_v51  ;;  %v365_v0 = vadd.f32 %v361_v44, %v357_v52  ;;  %v366_v1 = vadd.f32 %v362_v45, %v358_v53  ;;  %v367_v2 = vadd.f32 %v363_v46, %v359_v54  ;;  %v402_v43 = vld [vmem:[%s1030_s10] sm:$0xf] }
  0x5a   : > { %v330_v3 = vadd.f32 %v329_v59, %v328_v55  ;;  %v337_v4 = vadd.f32 %v336_v60, %v335_v56  ;;  %v344_v5 = vadd.f32 %v343_v61, %v342_v57  ;;  %v351_v6 = vadd.f32 %v350_v62, %v349_v58  ;;  %v416_v56 = vld [vmem:[%s1033_s18] sm:$0xf] }
  0x5b   : > { %v368_v7 = vsel %vm289_vm0, %v364_v63, 0.0  ;;  %v375_v8 = vsel %vm289_vm0, %v365_v0, 0.0  ;;  %v382_v9 = vsel %vm289_vm0, %v366_v1, 0.0  ;;  %v389_v10 = vsel %vm289_vm0, %v367_v2, 0.0 }
  0x5c   : > { %v331_v11 = vrot.slane %v330_v3, 2  ;;  %v338_v12 = vrot.slane %v337_v4, 2  ;;  %v345_v13 = vrot.slane %v344_v5, 2  ;;  %v352_v14 = vrot.slane %v351_v6, 2 }
  0x5d   : > { %v369_v15 = vrot.slane %v368_v7, 4  ;;  %v376_v16 = vrot.slane %v375_v8, 4  ;;  %v383_v17 = vrot.slane %v382_v9, 4  ;;  %v390_v18 = vrot.slane %v389_v10, 4 }
  0x5e   : > { %v332_v19 = vadd.f32 %v331_v11, %v330_v3  ;;  %v339_v20 = vadd.f32 %v338_v12, %v337_v4  ;;  %v346_v21 = vadd.f32 %v345_v13, %v344_v5  ;;  %v353_v22 = vadd.f32 %v352_v14, %v351_v6 }
  0x5f   : > { %v370_v23 = vadd.f32 %v369_v15, %v368_v7  ;;  %v377_v24 = vadd.f32 %v376_v16, %v375_v8  ;;  %v384_v25 = vadd.f32 %v383_v17, %v382_v9  ;;  %v391_v26 = vadd.f32 %v390_v18, %v389_v10 }
  0x60   : > { %v333_v27 = vrot.slane %v332_v19, 1  ;;  %v340_v28 = vrot.slane %v339_v20, 1  ;;  %v347_v29 = vrot.slane %v346_v21, 1  ;;  %v354_v30 = vrot.slane %v353_v22, 1 }
  0x61   : > { %v371_v31 = vrot.slane %v370_v23, 2  ;;  %v378_v32 = vrot.slane %v377_v24, 2  ;;  %v385_v33 = vrot.slane %v384_v25, 2  ;;  %v392_v34 = vrot.slane %v391_v26, 2 }
  0x62   : > { %v334_v35 = vadd.f32 %v333_v27, %v332_v19  ;;  %v341_v36 = vadd.f32 %v340_v28, %v339_v20  ;;  %v348_v37 = vadd.f32 %v347_v29, %v346_v21  ;;  %v355_v38 = vadd.f32 %v354_v30, %v353_v22 }
  0x63   : > { %v372_v39 = vadd.f32 %v371_v31, %v370_v23  ;;  %v379_v40 = vadd.f32 %v378_v32, %v377_v24  ;;  %v386_v41 = vadd.f32 %v385_v33, %v384_v25  ;;  %v393_v42 = vadd.f32 %v392_v34, %v391_v26 }
  0x64   : > { %v408_v44 = vsel %vm407_vm1, %v341_v36, %v334_v35 }
  0x65   : > { %v410_v45 = vsel %vm409_vm2, %v348_v37, %v408_v44  ;;  %v373_v46 = vrot.slane %v372_v39, 1  ;;  %v380_v47 = vrot.slane %v379_v40, 1  ;;  %v387_v48 = vrot.slane %v386_v41, 1 }
  0x66   : > { %v412_v49 = vsel %vm411_vm3, %v355_v38, %v410_v45  ;;  %v394_v50 = vrot.slane %v393_v42, 1 }
  0x67   : > { %v414_v51 = vadd.f32 %v412_v49, %v402_v43  ;;  %v374_v52 = vadd.f32 %v373_v46, %v372_v39  ;;  %v381_v53 = vadd.f32 %v380_v47, %v379_v40  ;;  %v388_v54 = vadd.f32 %v387_v48, %v386_v41 }
  0x68   : > { %v395_v55 = vadd.f32 %v394_v50, %v393_v42 }
  0x69   : > { %415 = vst [vmem:[%s1030_s10] sm:$0xf] %v414_v51  ;;  %v421_v57 = vsel %vm407_vm1, %v381_v53, %v374_v52 }
  0x6a   : > { %v422_v58 = vsel %vm409_vm2, %v388_v54, %v421_v57 }
  0x6b   : > { %808 = shalt.err (!%p805_p13)
}
  0x6c   : > { %640 = dma.vmem_to_hbm [thread:$0]  (%p975_p9), %s448_s4, 64, %s450_s5, %s428_s9   ;;  %v423_v59 = vsel %vm411_vm3, %v395_v55, %v422_v58 }
  0x6d   : > { %v425_v60 = vadd.f32 %v423_v59, %v416_v56  ;;  %s433_s21 = scalar_lea.sflag [#allocation9], %s1014_s0  ;;  %s823_s23 = sshra.s32 %s466_s15, 4  ;;  %s824_s23 = int_to_ptr.hbm [resolvable:$true] %s823_s23 }
  0x6e   : > { %s825_s22 = scalar_lea.hbm %s824_s23, 4  ;;  %s829_s11 = scalar_lea.hbm %s1130_s3, 8 }
  0x6f   : > { %426 = vst [vmem:[%s1033_s18] sm:$0xf] %v425_v60  ;;  %p826_p0 = scmp.ne.s32.totalorder %s824_s23, %s825_s22  ;;  %p830_p3 = scmp.lt.s32.totalorder %s824_s23, %s1130_s3 }
  0x70   : > { %p831_p4 = scmp.lt.s32.totalorder %s829_s11, %s825_s22 }
  0x71   : > { %p827_p1 = pnand %p826_p0, %p975_p9 }
  0x72   : > { %p832_p5 = por %p831_p4, %p830_p3 }
  0x73   : > { %p828_p2 = pneg %p827_p1 }
  0x75   : > { %p833_p6 = pnand %p832_p5, %p828_p2 }
  0x77   : > { %836 = shalt.err (!%p833_p6)
}
  0x78   : > { %641 = dma.vmem_to_hbm [thread:$0]  (%p975_p9), %s464_s8, 64, %s466_s15, %s433_s21  }
  0x79 PF: > { %s477_s0 = sand.u32 1, %s879_s12   ;;  %p652_p7 = pnand %p616_p12, %p982_p11 }
  0x7a   : > { %s478_s18 = scalar_lea.sflag [#allocation4], %s477_s0 }
  0x7b   : > { %p653_p8 = pneg %p652_p7 }
  0x7d   : > { %870 = dma.done.wait (%p653_p8), %s478_s18, 64  }
  0x7e   : > { %872 = vsyncadd (%p653_p8), %s478_s18, 4294967232  ;;  %s488_s5 = scalar_lea.sflag [#allocation9], %s477_s0 }
  0x7f   : > { %874 = dma.done.wait (%p653_p8), %s488_s5, 64  }
  0x80   : > { %876 = vsyncadd (%p653_p8), %s488_s5, 4294967232  ;;  %s26_s17 = sadd.s32 1, %s899_s17   ;;  %s1138_s12 = smov %s883_s13 }
  0x81   : > { %p23_p10 = scmp.ge.s32.totalorder %s26_s17, 4   ;;  %s1139_s13 = smov %s887_s14 }
  0x82   : > { %s1140_s14 = smov %s980_s26  ;;  %s1141_s15 = smov %s895_s16 }
  0x83   : > { %s1142_s16 = smov %s1144_s20  ;;  %25 = sbr.rel (!%p23_p10) target bundleno = 12 (0xc), region = 107 }
  0x88   :  { %494 = vsyncpa [#allocation3], 1 }
  0x89   :  { %496 = vsyncpa [#allocation3 + $0x1], 1 }
  0x8a   :  { %497 = vsyncpa [#allocation6], 1 }
  0x8b   :  { %499 = vsyncpa [#allocation6 + $0x1], 1 }
  0x8c   :  { %500 = vsyncpa [#allocation4], 1 }
  0x8d   :  { %502 = vsyncpa [#allocation4 + $0x1], 1 }
  0x8e   :  { %503 = vsyncpa [#allocation9], 1 }
  0x8f   :  { %505 = vsyncpa [#allocation9 + $0x1], 1 }

</bundles_post_ra>
